<compile_context>
chip_gen: v5e
topology: v5e:2x2
jax: 0.10.0
libtpu: 0.0.40
codegen_flags: <defaults>
</compile_context>

<pallas_src>
import functools

import jax
import jax.numpy as jnp
from jax import lax
from jax.experimental import pallas as pl
from jax.experimental.pallas import tpu as pltpu

_LANES = 128  # lane width; last dim of the flattened mask slab


# ---------------------------------------------------------------------------
# Single fused kernel: linear pass + threshold + mask compare.
# Whole problem is ~10 KB, so everything lives in VMEM as one block (no grid).
# ---------------------------------------------------------------------------
def _fused_kernel(x_ref, wt_ref, b_ref, mask_ref, out_ref, thr_ref, gt_ref,
                  *, valid_total, needs_tail_mask):
    # LINEAR PASS: x:[N,K] @ Wt:[K,M] -> [N,M]  (weight pre-transposed at init,
    # so this is a plain (1,0) contraction feeding the MXU directly).
    out = jnp.dot(x_ref[...], wt_ref[...],
                  preferred_element_type=jnp.float32) + b_ref[...]
    out_ref[...] = out

    # MASK INDICES (scalar part): out.sum(axis=1).mean() == sum(out) / N
    n = out.shape[0]
    thr = jnp.sum(out) * jnp.float32(1.0 / n)
    thr_ref[0] = thr

    # MASK INDICES (vector part): lane-dense compare over the flattened mask.
    gt = mask_ref[...] > thr
    if needs_tail_mask:
        # Neutralize the zero-padded ragged tail (dtype-agnostic, one VPU op).
        rows, lanes = mask_ref.shape
        flat_idx = (lax.broadcasted_iota(jnp.int32, (rows, lanes), 0) * lanes
                    + lax.broadcasted_iota(jnp.int32, (rows, lanes), 1))
        gt = jnp.logical_and(gt, flat_idx < valid_total)
    gt_ref[...] = gt.astype(jnp.int8)


def fused_forward(x, w_t, b, mask):
    """Returns (out [N,M] f32, thr [1] f32, gt bool with mask.shape)."""
    N, K = x.shape
    Kw, M = w_t.shape
    assert K == Kw, "weight must be pre-transposed to [in_features, out_features]"
    mask_shape = mask.shape

    # Flatten mask to a lane-dense (rows, 128) slab. Ragged tails are
    # zero-padded here and masked out inside the kernel (dead at 512 elems).
    total = int(mask.size)
    rows = pl.cdiv(total, _LANES)
    padded = rows * _LANES
    mask_flat = mask.reshape(-1)
    needs_tail_mask = padded != total
    if needs_tail_mask:
        mask_flat = jnp.pad(mask_flat, (0, padded - total))
    mask2d = mask_flat.reshape(rows, _LANES)

    b2 = b.reshape(1, M)  # broadcastable bias row

    kernel = functools.partial(_fused_kernel,
                               valid_total=total,
                               needs_tail_mask=needs_tail_mask)

    out, thr, gt2d = pl.pallas_call(
        kernel,
        out_shape=(
            jax.ShapeDtypeStruct((N, M), jnp.float32),
            jax.ShapeDtypeStruct((1,), jnp.float32),
            jax.ShapeDtypeStruct((rows, _LANES), jnp.int8),
        ),
        in_specs=[
            pl.BlockSpec(memory_space=pltpu.MemorySpace.VMEM),  # x
            pl.BlockSpec(memory_space=pltpu.MemorySpace.VMEM),  # w_t [K,M]
            pl.BlockSpec(memory_space=pltpu.MemorySpace.VMEM),  # b   [1,M]
            pl.BlockSpec(memory_space=pltpu.MemorySpace.VMEM),  # mask slab
        ],
        out_specs=(
            pl.BlockSpec(memory_space=pltpu.MemorySpace.VMEM),  # out
            pl.BlockSpec(memory_space=pltpu.MemorySpace.SMEM),  # thr (1,)
            pl.BlockSpec(memory_space=pltpu.MemorySpace.VMEM),  # gt slab i8
        ),
    )(x, w_t, b2, mask2d)

    gt = gt2d.reshape(-1)[:total].reshape(mask_shape).astype(bool)
    return out, thr, gt


@jax.jit
def _forward_jit(x, w_t, b, mask):
    out, thr, gt = fused_forward(x, w_t, b, mask)
    # Static-shaped nonzero fuses into the same program; padded entries = 0.
    idx_padded = jnp.nonzero(gt, size=int(mask.size), fill_value=0)
    count = jnp.sum(gt.astype(jnp.int32))
    return out, thr, idx_padded, count


def my_module_forward(x, mask, w_t, b):
    out, thr, idx_padded, count = _forward_jit(x, w_t, b, mask)
    # TODO(synk): nonzero has a data-dependent output shape; one host sync on
    # the hit count is required to trim the static-size index arrays so the
    # returned tuple matches torch's nonzero(as_tuple=True) exactly.
    n = int(count)
    hi_idx = tuple(i[:n] for i in idx_padded)
    return out, thr, hi_idx


if __name__ == "__main__":
    key = jax.random.PRNGKey(0)
    k1, k2, k3, k4 = jax.random.split(key, 4)

    # small shapes consistent with the module: batch=8, in=32, out=16, mask 8^3
    N, K, M = 8, 32, 16
    D0 = D1 = D2 = 8

    x = jax.random.uniform(k1, (N, K), dtype=jnp.float32)
    mask = jax.random.uniform(k2, (D0, D1, D2), dtype=jnp.float32)

    # deterministic nn.Linear-style init (uniform(-1/sqrt(K), 1/sqrt(K)))
    bound = 1.0 / (K ** 0.5)
    w = jax.random.uniform(k3, (M, K), dtype=jnp.float32,
                           minval=-bound, maxval=bound)
    b = jax.random.uniform(k4, (M,), dtype=jnp.float32,
                           minval=-bound, maxval=bound)

    # Pre-transpose the weight ONCE at parameter-load time (amortized to zero).
    w_t = jnp.asarray(w.T)  # [K, M]

    out, thr, hi_idx = my_module_forward(x, mask, w_t, b)
    jax.block_until_ready((out, thr) + tuple(hi_idx))

    # reference check in plain JAX
    ref_out = x @ w.T + b
    ref_thr = ref_out.sum(axis=1).mean()
    ref_idx = jnp.nonzero(mask > ref_thr)
    assert jnp.allclose(out, ref_out, atol=1e-5, rtol=1e-5)
    assert jnp.allclose(thr[0], ref_thr, atol=1e-4, rtol=1e-5)
    assert all(jnp.array_equal(a, b_) for a, b_ in zip(hi_idx, ref_idx))

    print("KERNEL_OK")
</pallas_src>

<mosaic_0001>
module attributes {stable_mosaic.version = 11 : i64} {
  func.func @_fused_kernel(%arg0: memref<8x32xf32, #tpu.memory_space<vmem>>, %arg1: memref<32x16xf32, #tpu.memory_space<vmem>>, %arg2: memref<1x16xf32, #tpu.memory_space<vmem>>, %arg3: memref<4x128xf32, #tpu.memory_space<vmem>>, %arg4: memref<8x16xf32, #tpu.memory_space<vmem>>, %arg5: memref<1xf32, #tpu.memory_space<smem>>, %arg6: memref<4x128xi8, #tpu.memory_space<vmem>>) attributes {dimension_semantics = [], scalar_prefetch = 0 : i64, scratch_operands = 0 : i64, tpu.core_type = #tpu.core_type<tc>} {
    %c0 = arith.constant 0 : index
    %c0_0 = arith.constant 0 : index
    %0 = vector.load %arg0[%c0, %c0_0] : memref<8x32xf32, #tpu.memory_space<vmem>>, vector<8x32xf32>
    %c0_1 = arith.constant 0 : index
    %c0_2 = arith.constant 0 : index
    %1 = vector.load %arg1[%c0_1, %c0_2] : memref<32x16xf32, #tpu.memory_space<vmem>>, vector<32x16xf32>
    %cst = arith.constant dense<0.000000e+00> : vector<8x16xf32>
    %2 = tpu.matmul %0, %1, %cst {dimension_numbers = #tpu.dot_dimension_numbers<[1], [0], [0], [1], [0, 0, 1, 1], [], []>} : vector<8x32xf32>, vector<32x16xf32>, vector<8x16xf32> -> vector<8x16xf32>
    %c0_3 = arith.constant 0 : index
    %c0_4 = arith.constant 0 : index
    %3 = vector.load %arg2[%c0_3, %c0_4] : memref<1x16xf32, #tpu.memory_space<vmem>>, vector<1x16xf32>
    %4 = vector.broadcast %3 : vector<1x16xf32> to vector<8x16xf32>
    %5 = arith.addf %2, %4 : vector<8x16xf32>
    %c0_5 = arith.constant 0 : index
    %c0_6 = arith.constant 0 : index
    %6 = vector.load %arg4[%c0_5, %c0_6] : memref<8x16xf32, #tpu.memory_space<vmem>>, vector<8x16xf32>
    tpu.vector_store %arg4[%c0_5, %c0_6], %5 {strides = array<i32>} : memref<8x16xf32, #tpu.memory_space<vmem>>, vector<8x16xf32>,
    %7 = vector.shape_cast %5 : vector<8x16xf32> to vector<1x8x16xf32>
    %cst_7 = arith.constant dense<0.000000e+00> : vector<1xf32>
    %8 = vector.multi_reduction <add>, %7, %cst_7 [1, 2] : vector<1x8x16xf32> to vector<1xf32>
    %9 = vector.shape_cast %8 : vector<1xf32> to vector<1x1x1xf32>
    %10 = vector.extract %9[0, 0, 0] : f32 from vector<1x1x1xf32>
    %cst_8 = arith.constant 1.250000e-01 : f32
    %11 = arith.mulf %10, %cst_8 : f32
    %c0_9 = arith.constant 0 : index
    %12 = memref.load %arg5[%c0_9] : memref<1xf32, #tpu.memory_space<smem>>
    memref.store %11, %arg5[%c0_9] : memref<1xf32, #tpu.memory_space<smem>>
    %c0_10 = arith.constant 0 : index
    %c0_11 = arith.constant 0 : index
    %13 = vector.load %arg3[%c0_10, %c0_11] : memref<4x128xf32, #tpu.memory_space<vmem>>, vector<4x128xf32>
    %14 = vector.broadcast %11 : f32 to vector<4x128xf32>
    %15 = arith.cmpf ogt, %13, %14 : vector<4x128xf32>
    %16 = arith.extui %15 : vector<4x128xi1> to vector<4x128xi8>
    %c0_12 = arith.constant 0 : index
    %c0_13 = arith.constant 0 : index
    %17 = vector.load %arg6[%c0_12, %c0_13] : memref<4x128xi8, #tpu.memory_space<vmem>>, vector<4x128xi8>
    tpu.vector_store %arg6[%c0_12, %c0_13], %16 {strides = array<i32>} : memref<4x128xi8, #tpu.memory_space<vmem>>, vector<4x128xi8>,
    return
  }
}

</mosaic_0001>

<bundles_post_ra>
// kernel: _forward_jit.1
= control target key start
LH: loop header
LB: loop body
LE: loop exit
PB: predicated region body
PF: predicated region fallthrough
CT: control target
= control target key end

     0   :  { %12 = vsyncpa [#allocation3], 0  ;;  %s232_s0 = inlined_call_operand.vmem [shape: f32[8,32], index: 0, kind: input, shape index: {}]   ;;  %s233_s1 = inlined_call_operand.vmem [shape: f32[32,16], index: 1, kind: input, shape index: {}]   ;;  %s234_s2 = inlined_call_operand.vmem [shape: f32[1,16], index: 2, kind: input, shape index: {}]   ;;  %s235_s3 = inlined_call_operand.vmem [shape: f32[4,128], index: 3, kind: input, shape index: {}]   ;;  %s236_s4 = inlined_call_operand.hbm [shape: f32[8,16], index: 4, kind: output, shape index: {0}]   ;;  %s237_s5 = inlined_call_operand.hbm [shape: f32[1], index: 5, kind: output, shape index: {1}]   ;;  %s238_s6 = inlined_call_operand.vmem [shape: s8[4,128], index: 6, kind: output, shape index: {2}]  }
   0x1   :  { %v28_v0 = vld [vmem:[%s233_s1 + $0x18] sm:$0xff]  ;;  %v27_v1 = vld [vmem:[%s233_s1 + $0x10] sm:$0xff]  ;;  %v26_v2 = vld [vmem:[%s233_s1 + $0x8] sm:$0xff] }
   0x2   :  { %49 = vmatpush.msra.mxu0 %v28_v0 }
   0x3   :  { %13 = vsyncpa [#allocation4], 0  ;;  %v25_v3 = vld [vmem:[%s233_s1] sm:$0xff]  ;;  %vm33_vm0 = vcmask 261120   ;;  %vm57_vm1 = vcmask 130048   ;;  %s164_s9 = smov [#allocation2]  }
   0x4   :  { %50 = vmatpush.msra.mxu0 %v27_v1  ;;  %v24_v4 = vld [vmem:[%s232_s0] sm:$0xff]  ;;  %s87_s1 = sshll.u32 %s164_s9, 4  ;;  %s89_s12 = sshll.u32 %s236_s4, 4  ;;  %v166_v18 = vmov 0   ;;  %s88_s1 = int_to_ptr.vmem [resolvable:$true] %s87_s1  ;;  %s90_s12 = int_to_ptr.hbm [resolvable:$true] %s89_s12 }
   0x5   :  { %v123_v5 = vld [vmem:[%s234_s2] ss:$0 sm:$0xff]  ;;  %s98_s13 = sshll.u32 %s237_s5, 4  ;;  %s165_s4 = smov [#allocation5]   ;;  %s99_s13 = int_to_ptr.hbm [resolvable:$true] %s98_s13 }
   0x6   :  { %51 = vmatpush.msra.mxu0 %v26_v2  ;;  %v72_v16 = vld [vmem:[%s235_s3] sm:$0xf] }
   0x8   :  { %52 = vmatpush.msra.mxu0 %v25_v3 }
   0x9   :  { %117 = vmatmul.msk.f32.vlgmr.msra.gmra.mxu0 %vm33_vm0, %v24_v4 }
  0x86   :  { %v54_v6 = vpop.f32.mrf.mxu0 }
  0x87   :  { %v55_v7 = vadd.f32 %v123_v5, %v54_v6 }
  0x89   :  { %v59_v8 = vsel %vm57_vm1, %v55_v7, 0.0  ;;  %58 = vst.msk [vmem:[#allocation2] sm:$0xff] %vm57_vm1, %v55_v7 }
  0x8a   :  { %60 = vadd.xlane.f32.xlu0 %v59_v8  ;;  %92 = dma.vmem_to_hbm [thread:$0]  %s88_s1, 128, %s90_s12, [#allocation3]  }
  0xfd   :  { %v61_v9 = vpop.xlane.xlu0 %60 }
  0xfe   :  { %v62_v10 = vrot.slane %v61_v9, 4 }
 0x100   :  { %v63_v11 = vadd.f32 %v62_v10, %v61_v9 }
 0x102   :  { %v64_v12 = vrot.slane %v63_v11, 2 }
 0x104   :  { %v65_v13 = vadd.f32 %v64_v12, %v63_v11 }
 0x106   :  { %v66_v14 = vrot.slane %v65_v13, 1 }
 0x108   :  { %v67_v15 = vadd.f32 %v66_v14, %v65_v13 }
 0x10a   :  { %118 = vpush %v67_v15 }
 0x13b   :  { %s119_s14 = spop %118 }
 0x13c   :  { %s69_s15 = smul.f32 0.125, %s119_s14 }
 0x13e   :  { %71 = sst [smem:[#allocation5]] %s69_s15  ;;  %v73_v17 = vstv %s69_s15 }
 0x13f   :  { %vm74_vm2 = vcmp.gt.f32.partialorder %v72_v16, %v73_v17  ;;  %101 = dma.smem_to_hbm %s165_s4, 16, %s99_s13, [#allocation4]  }
 0x140   :  { %vm75_vm3 = vmpackc.low %vm74_vm2, %vm74_vm2 }
 0x141   :  { %v76_v19 = vsel %vm75_vm3, 16711935, %v166_v18 }
 0x142   :  { %v78_v20 = vpack.c.b8 %v76_v19, %v76_v19 }
 0x144   :  { %vm79_vm4 = vnez %v78_v20 }
 0x145   :  { %v80_v21 = vsel %vm79_vm4, 16843009, %v166_v18 }
 0x146   :  { %81 = vst [vmem:[%s238_s6] sm:$0x1] %v80_v21 }
 0x147   :  { %160 = dma.done.wait [#allocation3], 128  }
 0x148   :  { %161 = vsyncadd [#allocation3], 4294967168 }
 0x149   :  { %162 = dma.done.wait [#allocation4], 16  }
 0x14a   :  { %163 = vsyncadd [#allocation4], 4294967280 }
 0x14b   :  { %114 = sfence }
 0x14c   :  { %115 = vsyncpa [#allocation3], 1 }
 0x14d   :  { %116 = vsyncpa [#allocation4], 1 }

</bundles_post_ra>
